<compile_context>
chip_gen: v6e
topology: v6e:2x2x1
jax: 0.10.0
libtpu: 0.0.40
codegen_flags: <defaults>
</compile_context>

<pallas_src>
import jax
import jax.numpy as jnp
import numpy as np
from jax.experimental import pallas as pl
from jax.experimental.pallas import tpu as pltpu


# ---------------------------------------------------------------------------
# in-kernel activation helpers.  Kernel tiles are (C, TL): the channel axis
# (nn.Softmax(dim=1)) is axis 0 (sublanes); the full channel extent is always
# present in one tile, so softmax is exact.
# ---------------------------------------------------------------------------
def _apply_act(y, act):
    if act == "relu":
        return jnp.maximum(y, 0.0)
    if act == "leakyrelu":
        return jnp.where(y >= 0.0, y, 0.01 * y)        # nn.LeakyReLU default slope
    if act == "sigmoid":
        return jax.nn.sigmoid(y)
    if act == "tanh":
        return jnp.tanh(y)
    if act == "softmax":                               # nn.Softmax(dim=1) == channels
        m = jnp.max(y, axis=0, keepdims=True)
        e = jnp.exp(y - m)
        return e / jnp.sum(e, axis=0, keepdims=True)
    return y                                           # None / 'none'


# ---------------------------------------------------------------------------
# fused all-layers kernel factory
# ---------------------------------------------------------------------------
def _make_fused_kernel(num_layers, residual, nlact, lact):
    per_layer = 3 if residual else 2                   # (W_x, [W_x0], b)

    def kernel(*refs):
        x_ref = refs[0]
        w_refs = refs[1:1 + num_layers * per_layer]
        o_ref = refs[1 + num_layers * per_layer]
        scratch = refs[2 + num_layers * per_layer:]

        x0 = x_ref[...]                                # (C0, TL), resident in VMEM
        x = x0                                         # layer 0 input: X == X0
        for l in range(num_layers):
            base = l * per_layer
            w_x = w_refs[base][...]
            if residual:
                w_x0 = w_refs[base + 1][...]
                b = w_refs[base + 2][...]
            else:
                b = w_refs[base + 1][...]
            # (Cout, TL) = (Cout, Cin) @ (Cin, TL)  -- lane-dense output tile
            y = jnp.dot(w_x, x, preferred_element_type=jnp.float32)
            if residual:
                y = y + jnp.dot(w_x0, x0, preferred_element_type=jnp.float32)
            y = y + b                                  # b is (Cout, 1): broadcast over lanes
            # NOTE: the PyTorch guard `idx != len(channels) - 1` is always true
            # (idx goes up to len(channels) - 2), so nlast_activation is applied
            # after EVERY layer, including the last filter.
            y = _apply_act(y, nlact)
            if l < num_layers - 1:
                scratch[l][...] = y                    # bound vreg live ranges via VMEM
                x = scratch[l][...]
            else:
                x = y
        if lact not in (None, "none"):
            x = _apply_act(x, lact)
        o_ref[...] = x.astype(o_ref.dtype)

    return kernel


# ---------------------------------------------------------------------------
# one-time parameter preprocessing (hoisted out of the forward path)
# ---------------------------------------------------------------------------
def prepare_params(params, c0, no_residual):
    """Split each W along Cin into (W_x, W_x0) and reshape bias to a column."""
    prepared = []
    for w, b in params:
        cout, cin_tot = w.shape
        b_col = b.reshape(cout, 1)
        if no_residual:
            prepared.append((w, None, b_col))
        else:
            cin_x = cin_tot - c0
            prepared.append((w[:, :cin_x], w[:, cin_x:], b_col))
    return prepared


def _pick_token_tile(L, target=512):
    for t in (2048, 1024, 512, 256, 128):
        if t <= target and L % t == 0:
            return t
    return L   # full-extent block is always legal


# ---------------------------------------------------------------------------
# MLP forward (mirrors models/MLP.py::MLP.forward), single fused pallas_call
# ---------------------------------------------------------------------------
def mlp_forward(features, prepared, *, no_residual, nlast_activation,
                last_activation, token_tile=512):
    """features: (N, C0, L) float32 (NCL).  prepared: list of (W_x, W_x0|None, b_col)."""
    N, C0, L = features.shape
    TL = _pick_token_tile(L, token_tile)
    residual = not no_residual
    num_layers = len(prepared)
    c_last = prepared[-1][0].shape[0]

    inputs = [features]
    in_specs = [pl.BlockSpec((None, C0, TL), lambda n, j: (n, 0, j))]
    for w_x, w_x0, b_col in prepared:
        inputs.append(w_x)
        in_specs.append(pl.BlockSpec(w_x.shape, lambda n, j: (0, 0)))
        if residual:
            inputs.append(w_x0)
            in_specs.append(pl.BlockSpec(w_x0.shape, lambda n, j: (0, 0)))
        inputs.append(b_col)
        in_specs.append(pl.BlockSpec(b_col.shape, lambda n, j: (0, 0)))

    # VMEM scratch for intermediate activations (channels[l+1], TL) f32
    scratch_shapes = [pltpu.VMEM((prepared[l][0].shape[0], TL), jnp.float32)
                      for l in range(num_layers - 1)]

    kernel = _make_fused_kernel(num_layers, residual, nlast_activation,
                                last_activation)

    return pl.pallas_call(
        kernel,
        out_shape=jax.ShapeDtypeStruct((N, c_last, L), features.dtype),
        grid_spec=pltpu.PrefetchScalarGridSpec(
            num_scalar_prefetch=0,
            grid=(N, L // TL),
            in_specs=in_specs,
            out_specs=pl.BlockSpec((None, c_last, TL), lambda n, j: (n, 0, j)),
            scratch_shapes=scratch_shapes,
        ),
        compiler_params=pltpu.CompilerParams(
            dimension_semantics=("parallel", "parallel"),
            vmem_limit_bytes=32 * 1024 * 1024,
        ),
    )(*inputs)


# ---------------------------------------------------------------------------
# pure-JAX reference (NCL layout, matching the PyTorch module semantics)
# ---------------------------------------------------------------------------
def _ref_act(y, act):
    if act == "relu":
        return jnp.maximum(y, 0.0)
    if act == "leakyrelu":
        return jnp.where(y >= 0.0, y, 0.01 * y)
    if act == "sigmoid":
        return jax.nn.sigmoid(y)
    if act == "tanh":
        return jnp.tanh(y)
    if act == "softmax":
        return jax.nn.softmax(y, axis=1)
    return y


def mlp_ref(features, params, *, no_residual, nlast_activation, last_activation):
    X = features
    X0 = features
    for w, b in params:
        inp = X if no_residual else jnp.concatenate([X, X0], axis=1)
        X = jnp.einsum("oc,ncl->nol", w, inp) + b[None, :, None]
        X = _ref_act(X, nlast_activation)
    if last_activation not in (None, "none"):
        X = _ref_act(X, last_activation)
    return X


# ---------------------------------------------------------------------------
# deterministic parameter construction (Conv1d kernel_size=1 => W:(Cout,Cin))
# ---------------------------------------------------------------------------
def init_params(key, channels, no_residual):
    # TODO(synk): nn.utils.weight_norm is a training-time reparametrization; at
    # deterministic init g = ||v|| so the forward pass equals a plain Conv1d,
    # which is what we model here.
    params = []
    for l in range(len(channels) - 1):
        cin = channels[l] if no_residual else channels[l] + channels[0]
        cout = channels[l + 1]
        key, kw, kb = jax.random.split(key, 3)
        bound = 1.0 / np.sqrt(cin)
        w = jax.random.uniform(kw, (cout, cin), jnp.float32, -bound, bound)
        b = jax.random.uniform(kb, (cout,), jnp.float32, -bound, bound)
        params.append((w, b))
    return params


if __name__ == "__main__":
    # opt = {'no_residual': False, 'last_activation': 'sigmoid',
    #        'nlast_activation': 'relu', 'norm': 'weight'}
    opt = dict(no_residual=False, last_activation="sigmoid",
               nlast_activation="relu", norm="weight")
    channels = [4, 32, 32, 8]

    key = jax.random.PRNGKey(0)
    key, kx = jax.random.split(key)
    N, C0, L = 2, channels[0], 512          # grid (N, L//TL) = (2, 1): >=2 parallel steps
    features = jax.random.normal(kx, (N, C0, L), jnp.float32)

    params = init_params(key, channels, opt["no_residual"])
    prepared = prepare_params(params, C0, opt["no_residual"])   # hoisted preprocessing

    out = mlp_forward(features, prepared,
                      no_residual=opt["no_residual"],
                      nlast_activation=opt["nlast_activation"],
                      last_activation=opt["last_activation"])
    out = jax.block_until_ready(out)

    ref = mlp_ref(features, params,
                  no_residual=opt["no_residual"],
                  nlast_activation=opt["nlast_activation"],
                  last_activation=opt["last_activation"])
    ref = jax.block_until_ready(ref)

    np.testing.assert_allclose(np.asarray(out), np.asarray(ref),
                               rtol=1e-5, atol=1e-5)
    print("KERNEL_OK")
</pallas_src>

<mosaic_0001>
module attributes {stable_mosaic.version = 11 : i64} {
  func.func @kernel(%arg0: i32, %arg1: i32, %arg2: memref<1x4x512xf32, #tpu.memory_space<vmem>>, %arg3: memref<32x4xf32, #tpu.memory_space<vmem>>, %arg4: memref<32x4xf32, #tpu.memory_space<vmem>>, %arg5: memref<32x1xf32, #tpu.memory_space<vmem>>, %arg6: memref<32x32xf32, #tpu.memory_space<vmem>>, %arg7: memref<32x4xf32, #tpu.memory_space<vmem>>, %arg8: memref<32x1xf32, #tpu.memory_space<vmem>>, %arg9: memref<8x32xf32, #tpu.memory_space<vmem>>, %arg10: memref<8x4xf32, #tpu.memory_space<vmem>>, %arg11: memref<8x1xf32, #tpu.memory_space<vmem>>, %arg12: memref<1x8x512xf32, #tpu.memory_space<vmem>>, %arg13: memref<32x512xf32, #tpu.memory_space<vmem>>, %arg14: memref<32x512xf32, #tpu.memory_space<vmem>>) attributes {dimension_semantics = [#tpu.dimension_semantics<parallel>, #tpu.dimension_semantics<parallel>], iteration_bounds = array<i64: 2, 1>, scalar_prefetch = 0 : i64, scratch_operands = 2 : i64, tpu.core_type = #tpu.core_type<tc>, window_params = [{transform_indices = @transform_0, window_bounds = array<i64: 1, 4, 512>}, {pipeline_mode = #tpu.pipeline_mode<synchronous>, transform_indices = @transform_1, window_bounds = array<i64: 32, 4>}, {pipeline_mode = #tpu.pipeline_mode<synchronous>, transform_indices = @transform_2, window_bounds = array<i64: 32, 4>}, {pipeline_mode = #tpu.pipeline_mode<synchronous>, transform_indices = @transform_3, window_bounds = array<i64: 32, 1>}, {pipeline_mode = #tpu.pipeline_mode<synchronous>, transform_indices = @transform_4, window_bounds = array<i64: 32, 32>}, {pipeline_mode = #tpu.pipeline_mode<synchronous>, transform_indices = @transform_5, window_bounds = array<i64: 32, 4>}, {pipeline_mode = #tpu.pipeline_mode<synchronous>, transform_indices = @transform_6, window_bounds = array<i64: 32, 1>}, {pipeline_mode = #tpu.pipeline_mode<synchronous>, transform_indices = @transform_7, window_bounds = array<i64: 8, 32>}, {pipeline_mode = #tpu.pipeline_mode<synchronous>, transform_indices = @transform_8, window_bounds = array<i64: 8, 4>}, {pipeline_mode = #tpu.pipeline_mode<synchronous>, transform_indices = @transform_9, window_bounds = array<i64: 8, 1>}, {transform_indices = @transform_10, window_bounds = array<i64: 1, 8, 512>}]} {
    %c0 = arith.constant 0 : index
    %c0_0 = arith.constant 0 : index
    %c0_1 = arith.constant 0 : index
    %0 = vector.load %arg2[%c0, %c0_0, %c0_1] : memref<1x4x512xf32, #tpu.memory_space<vmem>>, vector<1x4x512xf32>
    %1 = vector.shape_cast %0 : vector<1x4x512xf32> to vector<4x512xf32>
    %c0_2 = arith.constant 0 : index
    %c0_3 = arith.constant 0 : index
    %2 = vector.load %arg3[%c0_2, %c0_3] : memref<32x4xf32, #tpu.memory_space<vmem>>, vector<32x4xf32>
    %c0_4 = arith.constant 0 : index
    %c0_5 = arith.constant 0 : index
    %3 = vector.load %arg4[%c0_4, %c0_5] : memref<32x4xf32, #tpu.memory_space<vmem>>, vector<32x4xf32>
    %c0_6 = arith.constant 0 : index
    %c0_7 = arith.constant 0 : index
    %4 = vector.load %arg5[%c0_6, %c0_7] : memref<32x1xf32, #tpu.memory_space<vmem>>, vector<32x1xf32>
    %cst = arith.constant dense<0.000000e+00> : vector<32x512xf32>
    %5 = tpu.matmul %2, %1, %cst {dimension_numbers = #tpu.dot_dimension_numbers<[1], [0], [0], [1], [0, 0, 1, 1], [], []>} : vector<32x4xf32>, vector<4x512xf32>, vector<32x512xf32> -> vector<32x512xf32>
    %cst_8 = arith.constant dense<0.000000e+00> : vector<32x512xf32>
    %6 = tpu.matmul %3, %1, %cst_8 {dimension_numbers = #tpu.dot_dimension_numbers<[1], [0], [0], [1], [0, 0, 1, 1], [], []>} : vector<32x4xf32>, vector<4x512xf32>, vector<32x512xf32> -> vector<32x512xf32>
    %7 = arith.addf %5, %6 : vector<32x512xf32>
    %8 = vector.broadcast %4 : vector<32x1xf32> to vector<32x512xf32>
    %9 = arith.addf %7, %8 : vector<32x512xf32>
    %cst_9 = arith.constant 0.000000e+00 : f32
    %10 = vector.broadcast %cst_9 : f32 to vector<32x512xf32>
    %11 = arith.maximumf %9, %10 : vector<32x512xf32>
    %c0_10 = arith.constant 0 : index
    %c0_11 = arith.constant 0 : index
    %12 = vector.load %arg13[%c0_10, %c0_11] : memref<32x512xf32, #tpu.memory_space<vmem>>, vector<32x512xf32>
    tpu.vector_store %arg13[%c0_10, %c0_11], %11 {strides = array<i32>} : memref<32x512xf32, #tpu.memory_space<vmem>>, vector<32x512xf32>,
    %c0_12 = arith.constant 0 : index
    %c0_13 = arith.constant 0 : index
    %13 = vector.load %arg13[%c0_12, %c0_13] : memref<32x512xf32, #tpu.memory_space<vmem>>, vector<32x512xf32>
    %c0_14 = arith.constant 0 : index
    %c0_15 = arith.constant 0 : index
    %14 = vector.load %arg6[%c0_14, %c0_15] : memref<32x32xf32, #tpu.memory_space<vmem>>, vector<32x32xf32>
    %c0_16 = arith.constant 0 : index
    %c0_17 = arith.constant 0 : index
    %15 = vector.load %arg7[%c0_16, %c0_17] : memref<32x4xf32, #tpu.memory_space<vmem>>, vector<32x4xf32>
    %c0_18 = arith.constant 0 : index
    %c0_19 = arith.constant 0 : index
    %16 = vector.load %arg8[%c0_18, %c0_19] : memref<32x1xf32, #tpu.memory_space<vmem>>, vector<32x1xf32>
    %cst_20 = arith.constant dense<0.000000e+00> : vector<32x512xf32>
    %17 = tpu.matmul %14, %13, %cst_20 {dimension_numbers = #tpu.dot_dimension_numbers<[1], [0], [0], [1], [0, 0, 1, 1], [], []>} : vector<32x32xf32>, vector<32x512xf32>, vector<32x512xf32> -> vector<32x512xf32>
    %cst_21 = arith.constant dense<0.000000e+00> : vector<32x512xf32>
    %18 = tpu.matmul %15, %1, %cst_21 {dimension_numbers = #tpu.dot_dimension_numbers<[1], [0], [0], [1], [0, 0, 1, 1], [], []>} : vector<32x4xf32>, vector<4x512xf32>, vector<32x512xf32> -> vector<32x512xf32>
    %19 = arith.addf %17, %18 : vector<32x512xf32>
    %20 = vector.broadcast %16 : vector<32x1xf32> to vector<32x512xf32>
    %21 = arith.addf %19, %20 : vector<32x512xf32>
    %cst_22 = arith.constant 0.000000e+00 : f32
    %22 = vector.broadcast %cst_22 : f32 to vector<32x512xf32>
    %23 = arith.maximumf %21, %22 : vector<32x512xf32>
    %c0_23 = arith.constant 0 : index
    %c0_24 = arith.constant 0 : index
    %24 = vector.load %arg14[%c0_23, %c0_24] : memref<32x512xf32, #tpu.memory_space<vmem>>, vector<32x512xf32>
    tpu.vector_store %arg14[%c0_23, %c0_24], %23 {strides = array<i32>} : memref<32x512xf32, #tpu.memory_space<vmem>>, vector<32x512xf32>,
    %c0_25 = arith.constant 0 : index
    %c0_26 = arith.constant 0 : index
    %25 = vector.load %arg14[%c0_25, %c0_26] : memref<32x512xf32, #tpu.memory_space<vmem>>, vector<32x512xf32>
    %c0_27 = arith.constant 0 : index
    %c0_28 = arith.constant 0 : index
    %26 = vector.load %arg9[%c0_27, %c0_28] : memref<8x32xf32, #tpu.memory_space<vmem>>, vector<8x32xf32>
    %c0_29 = arith.constant 0 : index
    %c0_30 = arith.constant 0 : index
    %27 = vector.load %arg10[%c0_29, %c0_30] : memref<8x4xf32, #tpu.memory_space<vmem>>, vector<8x4xf32>
    %c0_31 = arith.constant 0 : index
    %c0_32 = arith.constant 0 : index
    %28 = vector.load %arg11[%c0_31, %c0_32] : memref<8x1xf32, #tpu.memory_space<vmem>>, vector<8x1xf32>
    %cst_33 = arith.constant dense<0.000000e+00> : vector<8x512xf32>
    %29 = tpu.matmul %26, %25, %cst_33 {dimension_numbers = #tpu.dot_dimension_numbers<[1], [0], [0], [1], [0, 0, 1, 1], [], []>} : vector<8x32xf32>, vector<32x512xf32>, vector<8x512xf32> -> vector<8x512xf32>
    %cst_34 = arith.constant dense<0.000000e+00> : vector<8x512xf32>
    %30 = tpu.matmul %27, %1, %cst_34 {dimension_numbers = #tpu.dot_dimension_numbers<[1], [0], [0], [1], [0, 0, 1, 1], [], []>} : vector<8x4xf32>, vector<4x512xf32>, vector<8x512xf32> -> vector<8x512xf32>
    %31 = arith.addf %29, %30 : vector<8x512xf32>
    %32 = vector.broadcast %28 : vector<8x1xf32> to vector<8x512xf32>
    %33 = arith.addf %31, %32 : vector<8x512xf32>
    %cst_35 = arith.constant 0.000000e+00 : f32
    %34 = vector.broadcast %cst_35 : f32 to vector<8x512xf32>
    %35 = arith.maximumf %33, %34 : vector<8x512xf32>
    %36 = arith.negf %35 : vector<8x512xf32>
    %37 = math.exp %36 : vector<8x512xf32>
    %cst_36 = arith.constant 1.000000e+00 : f32
    %38 = vector.broadcast %cst_36 : f32 to vector<8x512xf32>
    %39 = arith.addf %38, %37 : vector<8x512xf32>
    %40 = arith.divf %38, %39 : vector<8x512xf32>
    %c0_37 = arith.constant 0 : index
    %c0_38 = arith.constant 0 : index
    %c0_39 = arith.constant 0 : index
    %41 = vector.load %arg12[%c0_37, %c0_38, %c0_39] : memref<1x8x512xf32, #tpu.memory_space<vmem>>, vector<1x8x512xf32>
    %42 = vector.shape_cast %41 : vector<1x8x512xf32> to vector<8x512xf32>
    %43 = vector.shape_cast %40 : vector<8x512xf32> to vector<1x8x512xf32>
    tpu.vector_store %arg12[%c0_37, %c0_38, %c0_39], %43 {strides = array<i32>} : memref<1x8x512xf32, #tpu.memory_space<vmem>>, vector<1x8x512xf32>,
    return
  }
  func.func @transform_0(%arg0: i32, %arg1: i32) -> (i32, i32, i32) {
    %c0_i32 = arith.constant 0 : i32
    %c0_i32_0 = arith.constant 0 : i32
    return %arg0, %c0_i32, %arg1 : i32, i32, i32
  }
  func.func @transform_1(%arg0: i32, %arg1: i32) -> (i32, i32) {
    %c0_i32 = arith.constant 0 : i32
    %c0_i32_0 = arith.constant 0 : i32
    %c0_i32_1 = arith.constant 0 : i32
    return %c0_i32, %c0_i32_0 : i32, i32
  }
  func.func @transform_2(%arg0: i32, %arg1: i32) -> (i32, i32) {
    %c0_i32 = arith.constant 0 : i32
    %c0_i32_0 = arith.constant 0 : i32
    %c0_i32_1 = arith.constant 0 : i32
    return %c0_i32, %c0_i32_0 : i32, i32
  }
  func.func @transform_3(%arg0: i32, %arg1: i32) -> (i32, i32) {
    %c0_i32 = arith.constant 0 : i32
    %c0_i32_0 = arith.constant 0 : i32
    %c0_i32_1 = arith.constant 0 : i32
    return %c0_i32, %c0_i32_0 : i32, i32
  }
  func.func @transform_4(%arg0: i32, %arg1: i32) -> (i32, i32) {
    %c0_i32 = arith.constant 0 : i32
    %c0_i32_0 = arith.constant 0 : i32
    %c0_i32_1 = arith.constant 0 : i32
    return %c0_i32, %c0_i32_0 : i32, i32
  }
  func.func @transform_5(%arg0: i32, %arg1: i32) -> (i32, i32) {
    %c0_i32 = arith.constant 0 : i32
    %c0_i32_0 = arith.constant 0 : i32
    %c0_i32_1 = arith.constant 0 : i32
    return %c0_i32, %c0_i32_0 : i32, i32
  }
  func.func @transform_6(%arg0: i32, %arg1: i32) -> (i32, i32) {
    %c0_i32 = arith.constant 0 : i32
    %c0_i32_0 = arith.constant 0 : i32
    %c0_i32_1 = arith.constant 0 : i32
    return %c0_i32, %c0_i32_0 : i32, i32
  }
  func.func @transform_7(%arg0: i32, %arg1: i32) -> (i32, i32) {
    %c0_i32 = arith.constant 0 : i32
    %c0_i32_0 = arith.constant 0 : i32
    %c0_i32_1 = arith.constant 0 : i32
    return %c0_i32, %c0_i32_0 : i32, i32
  }
  func.func @transform_8(%arg0: i32, %arg1: i32) -> (i32, i32) {
    %c0_i32 = arith.constant 0 : i32
    %c0_i32_0 = arith.constant 0 : i32
    %c0_i32_1 = arith.constant 0 : i32
    return %c0_i32, %c0_i32_0 : i32, i32
  }
  func.func @transform_9(%arg0: i32, %arg1: i32) -> (i32, i32) {
    %c0_i32 = arith.constant 0 : i32
    %c0_i32_0 = arith.constant 0 : i32
    %c0_i32_1 = arith.constant 0 : i32
    return %c0_i32, %c0_i32_0 : i32, i32
  }
  func.func @transform_10(%arg0: i32, %arg1: i32) -> (i32, i32, i32) {
    %c0_i32 = arith.constant 0 : i32
    %c0_i32_0 = arith.constant 0 : i32
    return %arg0, %c0_i32, %arg1 : i32, i32, i32
  }
}

</mosaic_0001>

<bundles_post_ra>
// kernel: tpu_custom_call.1
= control target key start
LH: loop header
LB: loop body
LE: loop exit
PB: predicated region body
PF: predicated region fallthrough
CT: control target
= control target key end

     0   :  { %15 = vsyncpa [#allocation5], 0  ;;  %s2377_s0 = inlined_call_operand.vmem [shape: f32[2,4,512], index: 0, kind: input, shape index: {}]   ;;  %s2378_s1 = inlined_call_operand.vmem [shape: f32[32,4], index: 1, kind: input, shape index: {}]   ;;  %s2379_s2 = inlined_call_operand.vmem [shape: f32[32,4], index: 2, kind: input, shape index: {}]   ;;  %s2380_s3 = inlined_call_operand.vmem [shape: f32[32,1], index: 3, kind: input, shape index: {}]   ;;  %s2381_s4 = inlined_call_operand.vmem [shape: f32[32,32], index: 4, kind: input, shape index: {}]   ;;  %s2382_s5 = inlined_call_operand.vmem [shape: f32[32,4], index: 5, kind: input, shape index: {}]   ;;  %s2383_s6 = inlined_call_operand.vmem [shape: f32[32,1], index: 6, kind: input, shape index: {}]   ;;  %s2384_s7 = inlined_call_operand.vmem [shape: f32[8,32], index: 7, kind: input, shape index: {}]   ;;  %s2385_s8 = inlined_call_operand.vmem [shape: f32[8,4], index: 8, kind: input, shape index: {}]   ;;  %s2386_s9 = inlined_call_operand.vmem [shape: f32[8,1], index: 9, kind: input, shape index: {}]   ;;  %s2387_s10 = inlined_call_operand.hbm [shape: f32[2,8,512], index: 10, kind: output, shape index: {}]  }
   0x1   :  { %17 = vsyncpa [#allocation5 + $0x1], 0  ;;  %s2069_s13 = smov 0   ;;  %s2071_s14 = smov 0  }
   0x2   :  { %s2073_s15 = smov 0   ;;  %s2075_s16 = smov 0  }
   0x3   :  { %s2077_s17 = smov 0   ;;  %s2079_s18 = smov 0  }
   0x4 LB: > { %2390 = sst [smem:[#allocation7_spill]] %s2005_s17  ;;  %s1785_s19 = sadd.s32 4294967295, %s2009_s18   ;;  %s2009_s18 = sphi %s2079_s18, %s23_s18   ;;  %s2005_s17 = sphi %s2077_s17, %s2397_s17   ;;  %s2001_s16 = sphi %s2075_s16, %s2396_s16   ;;  %s1997_s15 = sphi %s2073_s15, %s2400_s15   ;;  %s1993_s14 = sphi %s2071_s14, %s2399_s14   ;;  %s1989_s13 = sphi %s2069_s13, %s2398_s13  }
   0x5   : > { %s1786_s20 = sadd.s32 4294967294, %s2009_s18   ;;  %s35_s21 = sadd.s32 1, %s2005_s17 }
   0x6   : > { %s261_s22 = sadd.s32 1, %s1997_s15  ;;  %p37_p0 = scmp.ge.s32.totalorder %s35_s21, 2 }
   0x7   : > { %p271_p1 = scmp.ne.s32.totalorder %s1997_s15, %s1993_s14  ;;  %p272_p2 = scmp.eq.s32.totalorder %s1785_s19, 1 }
   0x8   : > { %p277_p3 = scmp.ne.s32.totalorder %s1993_s14, %s1989_s13  ;;  %s2402_s21 = smov (%p37_p0, %s35_s21), 0 }
   0x9   : > { %2391 = sst [smem:[#allocation8_spill]] %s2402_s21  ;;  %p2109_p4 = por %p272_p2, %p271_p1 }
   0xa   : > { %p278_p5 = scmp.eq.s32.totalorder %s1786_s20, 1  ;;  %s256_s24 = ssub.s32 %s2005_s17, %s2402_s21 }
   0xb   : > { %p1789_p6 = scmp.ge.s32.totalorder %s2009_s18, 1  ;;  %p259_p7 = scmp.eq.s32.totalorder %s256_s24, 0 }
   0xc   : > { %p2116_p8 = por %p278_p5, %p277_p3  ;;  %p336_p9 = scmp.lt.s32.totalorder %s2009_s18, 3 }
   0xd   : > { %s2122_s26 = scalar_select %p259_p7, %s1997_s15, %s261_s22  }
   0xe   : > { %p337_p10 = pnand %p1789_p6, %p336_p9 }
   0xf   : > { %2394 = sst [smem:[#allocation9_spill]] %s2122_s26  ;;  %p379_p11 = scmp.lt.s32.totalorder (!%p337_p10), %s2001_s16, 1 }
  0x10   : > { %340 = sbr.rel (%p337_p10) target bundleno = 736 (0x2e0), region = 60  ;;  %s375_s11 = sand.u32 (!%p337_p10), 1, %s1993_s14  }
  0x11   : > { %s1855_s19 = sshll.u32 (!%p337_p10), %s2001_s16, 9  ;;  %s2013_s26 = smov (!%p337_p10), [#allocation4]  }
  0x12   : > { %s2331_s21 = scalar_lea.hbm (!%p337_p10), %s2387_s10, %s1855_s19  ;;  %s1937_s28 = sshll.u32 (!%p337_p10), %s2013_s26, 4  ;;  %s1938_s28 = int_to_ptr.vmem [resolvable:$false] %s1937_s28 }
  0x13   : > { %s1939_s29 = scalar_lea.vmem (!%p337_p10), %s1938_s28, 1024 }
  0x15   : > { %v2011_v0 = vmov 0.0   ;;  %s380_s27 = scalar_select %p379_p11, %s2001_s16, 1  ;;  %v2012_v1 = vmov 0   ;;  %v400_v2 = vld [vmem:[%s2380_s3 + $0x8] sm:$0xff]  ;;  %v402_v3 = vld [vmem:[%s2380_s3 + $0x18] sm:$0xff]  ;;  %v399_v4 = vld [vmem:[%s2380_s3] sm:$0xff] }
  0x16   : > { %493 = vmatprep.mubr.f32.mxu0 %v2011_v0  ;;  %582 = vmatprep.mubr.f32.mxu1 %v2011_v0  ;;  %v401_v5 = vld [vmem:[%s2380_s3 + $0x10] sm:$0xff]  ;;  %vm420_vm0 = vcmask 1043456   ;;  %v395_v10 = vld [vmem:[%s2379_s2] sm:$0xff]  ;;  %vm407_vm1 = vcmask 31744   ;;  %v396_v11 = vld [vmem:[%s2379_s2 + $0x8] sm:$0xff]  ;;  %vm1083_vm2 = vcmask 261120  }
  0x17   : > { %1914 = vset.pattern.permute.xlu1 %v2012_v1  ;;  %1913 = vset.pattern.permute.xlu0 %v2012_v1  ;;  %s1854_s12 = sshll.u32 %s380_s27, 4  ;;  %v892_v12 = vld [vmem:[%s2383_s6 + $0x18] sm:$0xff]  ;;  %v891_v13 = vld [vmem:[%s2383_s6 + $0x10] sm:$0xff]  ;;  %v890_v15 = vld [vmem:[%s2383_s6 + $0x8] sm:$0xff]  ;;  %s1693_s16 = scalar_lea.sflag [#allocation5], %s375_s11 }
  0x18   : > { %804 = vperm.xlu1 %1914, %v400_v2   ;;  %814 = vperm.xlu0 %1913, %v402_v3   ;;  %s386_s22 = scalar_lea.vmem %s2377_s0, %s1854_s12  ;;  %v397_v14 = vld [vmem:[%s2379_s2 + $0x10] sm:$0xff]  ;;  %v889_v16 = vld [vmem:[%s2383_s6] sm:$0xff]  ;;  %v398_v17 = vld [vmem:[%s2379_s2 + $0x18] sm:$0xff]  ;;  %s1790_s12 = sshll.u32 %s375_s11, 5 }
  0x19   : > { %v2143_v6 = vld [vmem:[%s386_s22] sm:$0xff]  ;;  %v2145_v7 = vld [vmem:[%s386_s22 + $0x8] sm:$0xff]  ;;  %v393_v21 = vld [vmem:[%s2378_s1 + $0x10] sm:$0xff]  ;;  %s377_s20 = scalar_lea.vmem [#allocation4], %s1790_s12 }
  0x1a   : > { %v2149_v8 = vcombine.high %v2143_v6, %v2143_v6  ;;  %v2153_v9 = vcombine.high %v2145_v7, %v2145_v7  ;;  %v1360_v18 = vld [vmem:[%s2386_s9] sm:$0xff]  ;;  %v392_v20 = vld [vmem:[%s2378_s1 + $0x8] sm:$0xff]  ;;  %v394_v22 = vld [vmem:[%s2378_s1 + $0x18] sm:$0xff]  ;;  %s1709_s22 = sshll.u32 %s377_s20, 4  ;;  %s2333_s22 = int_to_ptr.vmem [resolvable:$true] %s1709_s22 }
  0x1b   : > { %v391_v19 = vld [vmem:[%s2378_s1] sm:$0xff]  ;;  %v886_v24 = vld [vmem:[%s2382_s5 + $0x8] sm:$0xff]  ;;  %v887_v25 = vld [vmem:[%s2382_s5 + $0x10] sm:$0xff]  ;;  %s1933_s17 = scalar_lea.vmem %s2333_s22, 512  ;;  %p1940_p1 = scmp.lt.s32.totalorder %s2333_s22, %s1938_s28 }
  0x1c   : > { %799 = vperm.xlu1 %1914, %v399_v4   ;;  %809 = vperm.xlu0 %1913, %v401_v5   ;;  %v885_v23 = vld [vmem:[%s2382_s5] sm:$0xff]  ;;  %v888_v26 = vld [vmem:[%s2382_s5 + $0x18] sm:$0xff]  ;;  %p1934_p12 = scmp.ne.s32.totalorder %s2333_s22, %s1933_s17  ;;  %p1941_p2 = scmp.lt.s32.totalorder %s1939_s29, %s1933_s17 }
  0x1d   : > { %1793 = vmatprep.subr.msk.mxu0 %vm420_vm0, %v2149_v8  ;;  %1799 = vmatprep.subr.msk.mxu1 %vm420_vm0, %v2153_v9 }
  0x1e   : > { %1794 = vmatpush1.msk.msra.mxu0 %vm420_vm0, %v2143_v6  ;;  %1800 = vmatpush1.msk.msra.mxu1 %vm420_vm0, %v2145_v7  ;;  %p1935_p13 = pnand %p1934_p12, %p2109_p4  ;;  %p1942_p3 = por %p1941_p2, %p1940_p1 }
  0x1f   : > { %1795 = vmatmul.mubr.msk.f32.vlgmr.msra.gmra.mxu0 %vm407_vm1, %v395_v10  ;;  %1801 = vmatmul.mubr.msk.f32.vlgmr.msra.gmra.mxu1 %vm407_vm1, %v395_v10 }
  0x20   : > { %499 = vmatprep.mubr.f32.mxu0 %v2011_v0  ;;  %588 = vmatprep.mubr.f32.mxu1 %v2011_v0  ;;  %p1936_p0 = pneg %p1935_p13 }
  0x21   : > { %1805 = vmatprep.subr.msk.mxu0 %vm420_vm0, %v2149_v8  ;;  %1811 = vmatprep.subr.msk.mxu1 %vm420_vm0, %v2153_v9 }
  0x22   : > { %1806 = vmatpush1.msk.msra.mxu0 %vm420_vm0, %v2143_v6  ;;  %1812 = vmatpush1.msk.msra.mxu1 %vm420_vm0, %v2145_v7  ;;  %p1943_p5 = pnand %p1942_p3, %p1936_p0 }
  0x23   : > { %1796 = vmatmul.mubr.msk.f32.gmra.mxu0 %vm407_vm1, %v396_v11  ;;  %1802 = vmatmul.mubr.msk.f32.gmra.mxu1 %vm407_vm1, %v396_v11 }
  0x24   : > { %505 = vmatprep.mubr.f32.mxu0 %v2011_v0  ;;  %594 = vmatprep.mubr.f32.mxu1 %v2011_v0 }
  0x25   : > { %1291 = vperm.xlu0 %1913, %v892_v12   ;;  %1286 = vperm.xlu1 %1914, %v891_v13  }
  0x26   : > { %1817 = vmatprep.subr.msk.mxu0 %vm420_vm0, %v2149_v8  ;;  %1823 = vmatprep.subr.msk.mxu1 %vm420_vm0, %v2153_v9 }
  0x27   : > { %1797 = vmatmul.mubr.msk.f32.gmra.mxu0 %vm407_vm1, %v397_v14  ;;  %1803 = vmatmul.mubr.msk.f32.gmra.mxu1 %vm407_vm1, %v397_v14 }
  0x28   : > { %511 = vmatprep.mubr.f32.mxu0 %v2011_v0  ;;  %600 = vmatprep.mubr.f32.mxu1 %v2011_v0 }
  0x29   : > { %1281 = vperm.xlu0 %1913, %v890_v15   ;;  %1276 = vperm.xlu1 %1914, %v889_v16  }
  0x2b   : > { %1798 = vmatmul.mubr.msk.f32.gmra.mxu0 %vm407_vm1, %v398_v17  ;;  %1804 = vmatmul.mubr.msk.f32.gmra.mxu1 %vm407_vm1, %v398_v17 }
  0x2c   : > { %683 = vmatprep.mubr.f32.mxu0 %v2011_v0  ;;  %772 = vmatprep.mubr.f32.mxu1 %v2011_v0 }
  0x2d   : > { %1653 = vperm.xlu0 %1913, %v1360_v18  }
  0x2f   : > { %1807 = vmatmul.mubr.msk.f32.vlgmr.msra.gmra.mxu0 %vm407_vm1, %v391_v19  ;;  %1813 = vmatmul.mubr.msk.f32.vlgmr.msra.gmra.mxu1 %vm407_vm1, %v391_v19 }
  0x30   : > { %689 = vmatprep.mubr.f32.mxu0 %v2011_v0  ;;  %778 = vmatprep.mubr.f32.mxu1 %v2011_v0 }
  0x31   : > { %1818 = vmatpush1.msk.msra.mxu0 %vm420_vm0, %v2143_v6  ;;  %1824 = vmatpush1.msk.msra.mxu1 %vm420_vm0, %v2145_v7 }
  0x33   : > { %1808 = vmatmul.mubr.msk.f32.gmra.mxu0 %vm407_vm1, %v392_v20  ;;  %1814 = vmatmul.mubr.msk.f32.gmra.mxu1 %vm407_vm1, %v392_v20 }
  0x34   : > { %695 = vmatprep.mubr.f32.mxu0 %v2011_v0  ;;  %784 = vmatprep.mubr.f32.mxu1 %v2011_v0 }
  0x37   : > { %1809 = vmatmul.mubr.msk.f32.gmra.mxu0 %vm407_vm1, %v393_v21  ;;  %1815 = vmatmul.mubr.msk.f32.gmra.mxu1 %vm407_vm1, %v393_v21 }
  0x38   : > { %701 = vmatprep.mubr.f32.mxu0 %v2011_v0  ;;  %790 = vmatprep.mubr.f32.mxu1 %v2011_v0 }
  0x3b   : > { %1810 = vmatmul.mubr.msk.f32.gmra.mxu0 %vm407_vm1, %v394_v22  ;;  %1816 = vmatmul.mubr.msk.f32.gmra.mxu1 %vm407_vm1, %v394_v22 }
  0x3c   : > { %969 = vmatprep.mubr.f32.mxu0 %v2011_v0  ;;  %1058 = vmatprep.mubr.f32.mxu1 %v2011_v0 }
  0x3f   : > { %1819 = vmatmul.mubr.msk.f32.vlgmr.msra.gmra.mxu0 %vm407_vm1, %v885_v23  ;;  %1825 = vmatmul.mubr.msk.f32.vlgmr.msra.gmra.mxu1 %vm407_vm1, %v885_v23 }
  0x40   : > { %975 = vmatprep.mubr.f32.mxu0 %v2011_v0  ;;  %1064 = vmatprep.mubr.f32.mxu1 %v2011_v0 }
  0x43   : > { %1820 = vmatmul.mubr.msk.f32.gmra.mxu0 %vm407_vm1, %v886_v24  ;;  %1826 = vmatmul.mubr.msk.f32.gmra.mxu1 %vm407_vm1, %v886_v24 }
  0x44   : > { %981 = vmatprep.mubr.f32.mxu0 %v2011_v0  ;;  %1070 = vmatprep.mubr.f32.mxu1 %v2011_v0 }
  0x47   : > { %1821 = vmatmul.mubr.msk.f32.gmra.mxu0 %vm407_vm1, %v887_v25  ;;  %1827 = vmatmul.mubr.msk.f32.gmra.mxu1 %vm407_vm1, %v887_v25 }
  0x48   : > { %987 = vmatprep.mubr.f32.mxu0 %v2011_v0  ;;  %1076 = vmatprep.mubr.f32.mxu1 %v2011_v0 }
  0x4b   : > { %1822 = vmatmul.mubr.msk.f32.gmra.mxu0 %vm407_vm1, %v888_v26  ;;  %1828 = vmatmul.mubr.msk.f32.gmra.mxu1 %vm407_vm1, %v888_v26 }
  0x4c   : > { %1160 = vmatprep.mubr.f32.mxu0 %v2011_v0  ;;  %1249 = vmatprep.mubr.f32.mxu1 %v2011_v0 }
  0x93   : > { %v815_v53 = vpop.permute.xlu0 %814  ;;  %v805_v58 = vpop.permute.xlu1 %804 }
  0x97   : > { %v810_v14 = vpop.permute.xlu0 %809 }
  0xdf   : > { %v495_v27 = vpop.f32.mrf.mxu0  ;;  %v584_v28 = vpop.f32.mrf.mxu1 }
  0xe1   : > { %v497_v29 = vpop.f32.mrf.mxu0  ;;  %v586_v30 = vpop.f32.mrf.mxu1 }
  0xe3   : > { %v501_v31 = vpop.f32.mrf.mxu0  ;;  %v590_v32 = vpop.f32.mrf.mxu1 }
  0xe5   : > { %v503_v33 = vpop.f32.mrf.mxu0  ;;  %v592_v34 = vpop.f32.mrf.mxu1 }
  0xe7   : > { %v507_v35 = vpop.f32.mrf.mxu0  ;;  %v596_v36 = vpop.f32.mrf.mxu1 }
  0xe9   : > { %v509_v37 = vpop.f32.mrf.mxu0  ;;  %v598_v38 = vpop.f32.mrf.mxu1 }
  0xeb   : > { %v513_v39 = vpop.f32.mrf.mxu0  ;;  %v602_v40 = vpop.f32.mrf.mxu1 }
  0xed   : > { %v515_v41 = vpop.f32.mrf.mxu0  ;;  %v604_v42 = vpop.f32.mrf.mxu1 }
  0xef   : > { %v685_v43 = vpop.f32.mrf.mxu0  ;;  %v774_v44 = vpop.f32.mrf.mxu1 }
  0xf0   : > { %v686_v23 = vadd.f32 %v685_v43, %v495_v27  ;;  %v775_v24 = vadd.f32 %v774_v44, %v584_v28 }
  0xf1   : > { %v687_v45 = vpop.f32.mrf.mxu0  ;;  %v776_v46 = vpop.f32.mrf.mxu1 }
  0xf2   : > { %v688_v63 = vadd.f32 %v687_v45, %v497_v29  ;;  %v777_v1 = vadd.f32 %v776_v46, %v586_v30  ;;  %v800_v29 = vpop.permute.xlu1 %799 }
  0xf3   : > { %v691_v47 = vpop.f32.mrf.mxu0  ;;  %v780_v48 = vpop.f32.mrf.mxu1  ;;  %v819_v27 = vadd.f32 %v800_v29, %v775_v24 }
  0xf4   : > { %v692_v15 = vadd.f32 %v691_v47, %v501_v31  ;;  %v781_v16 = vadd.f32 %v780_v48, %v590_v32  ;;  %v818_v32 = vadd.f32 %v800_v29, %v688_v63 }
  0xf5   : > { %v693_v49 = vpop.f32.mrf.mxu0  ;;  %v782_v50 = vpop.f32.mrf.mxu1 }
  0xf6   : > { %v694_v10 = vadd.f32 %v693_v49, %v503_v33  ;;  %v783_v11 = vadd.f32 %v782_v50, %v592_v34  ;;  %v834_v48 = vmax.f32 %v818_v32, 0.0  ;;  %v1287_v24 = vpop.permute.xlu1 %1286 }
  0xf7   : > { %v697_v51 = vpop.f32.mrf.mxu0  ;;  %v786_v52 = vpop.f32.mrf.mxu1 }
  0xf8   : > { %v698_v2 = vadd.f32 %v697_v51, %v507_v35  ;;  %v787_v3 = vadd.f32 %v786_v52, %v596_v36  ;;  %v822_v30 = vadd.f32 %v805_v58, %v694_v10  ;;  %v824_v35 = vadd.f32 %v805_v58, %v783_v11  ;;  %v881_v52 = vld [vmem:[%s2381_s4] sm:$0xff] }
  0xf9   : > { %v699_v54 = vpop.f32.mrf.mxu0  ;;  %v788_v55 = vpop.f32.mrf.mxu1  ;;  %v821_v36 = vadd.f32 %v805_v58, %v692_v15  ;;  %v835_v51 = vmax.f32 %v819_v27, 0.0 }
  0xfa   : > { %v700_v59 = vadd.f32 %v699_v54, %v509_v37  ;;  %v789_v60 = vadd.f32 %v788_v55, %v598_v38  ;;  %v825_v25 = vadd.f32 %v810_v14, %v698_v2  ;;  %v827_v26 = vadd.f32 %v810_v14, %v787_v3 }
  0xfb   : > { %v703_v56 = vpop.f32.mrf.mxu0  ;;  %v792_v57 = vpop.f32.mrf.mxu1  ;;  %v823_v37 = vadd.f32 %v805_v58, %v781_v16  ;;  %v838_v44 = vmax.f32 %v822_v30, 0.0  ;;  %v840_v45 = vmax.f32 %v824_v35, 0.0  ;;  %v837_v46 = vmax.f32 %v821_v36, 0.0 }
  0xfc   : > { %v704_v61 = vadd.f32 %v703_v56, %v513_v39  ;;  %v793_v62 = vadd.f32 %v792_v57, %v602_v40  ;;  %v826_v19 = vadd.f32 %v810_v14, %v700_v59  ;;  %v828_v20 = vadd.f32 %v810_v14, %v789_v60 }
  0xfd   : > { %v705_v4 = vpop.f32.mrf.mxu0  ;;  %v794_v5 = vpop.f32.mrf.mxu1  ;;  %v820_v39 = vadd.f32 %v800_v29, %v777_v1  ;;  %v841_v28 = vmax.f32 %v825_v25, 0.0  ;;  %v843_v43 = vmax.f32 %v827_v26, 0.0  ;;  %v839_v47 = vmax.f32 %v823_v37, 0.0 }
  0xfe   : > { %v706_v12 = vadd.f32 %v705_v4, %v515_v41  ;;  %v795_v13 = vadd.f32 %v794_v5, %v604_v42  ;;  %v829_v17 = vadd.f32 %v815_v53, %v704_v61  ;;  %v831_v18 = vadd.f32 %v815_v53, %v793_v62 }
  0xff   : > { %v842_v40 = vmax.f32 %v826_v19, 0.0  ;;  %v844_v41 = vmax.f32 %v828_v20, 0.0  ;;  %v817_v42 = vadd.f32 %v800_v29, %v686_v23  ;;  %v836_v49 = vmax.f32 %v820_v39, 0.0  ;;  %v1060_v54 = vpop.f32.mrf.mxu1 }
 0x100   : > { %v830_v21 = vadd.f32 %v815_v53, %v706_v12  ;;  %v832_v22 = vadd.f32 %v815_v53, %v795_v13  ;;  %v845_v38 = vmax.f32 %v829_v17, 0.0  ;;  %v847_v31 = vmax.f32 %v831_v18, 0.0  ;;  %v882_v53 = vld [vmem:[%s2381_s4 + $0x8] sm:$0xff] }
 0x101   : > { %v833_v50 = vmax.f32 %v817_v42, 0.0  ;;  %v1062_v56 = vpop.f32.mrf.mxu1 }
 0x102   : > { %v846_v33 = vmax.f32 %v830_v21, 0.0  ;;  %v848_v34 = vmax.f32 %v832_v22, 0.0  ;;  %v1292_v21 = vpop.permute.xlu0 %1291 }
 0x103   : > { %v1066_v58 = vpop.f32.mrf.mxu1 }
 0x104   : > { %1120 = vmatprep.subr.mxu0 %v846_v33  ;;  %1209 = vmatprep.subr.mxu1 %v848_v34 }
 0x105   : > { %1121 = vmatpush1.msra.mxu0 %v845_v38  ;;  %1210 = vmatpush1.msra.mxu1 %v847_v31  ;;  %v1068_v60 = vpop.f32.mrf.mxu1 }
 0x106   : > { %1122 = vmatprep.subr.mxu0 %v842_v40  ;;  %1211 = vmatprep.subr.mxu1 %v844_v41 }
 0x107   : > { %1123 = vmatpush1.msra.mxu0 %v841_v28  ;;  %1212 = vmatpush1.msra.mxu1 %v843_v43  ;;  %v1072_v62 = vpop.f32.mrf.mxu1 }
 0x108   : > { %1124 = vmatprep.subr.mxu0 %v838_v44  ;;  %1213 = vmatprep.subr.mxu1 %v840_v45 }
 0x109   : > { %1125 = vmatpush1.msra.mxu0 %v837_v46  ;;  %1214 = vmatpush1.msra.mxu1 %v839_v47  ;;  %v1074_v1 = vpop.f32.mrf.mxu1  ;;  %v1282_v47 = vpop.permute.xlu0 %1281 }
 0x10a   : > { %1126 = vmatprep.subr.mxu0 %v834_v48  ;;  %1215 = vmatprep.subr.mxu1 %v836_v49 }
 0x10b   : > { %1127 = vmatpush1.msra.mxu0 %v833_v50  ;;  %1216 = vmatpush1.msra.mxu1 %v835_v51  ;;  %v1078_v3 = vpop.f32.mrf.mxu1 }
 0x10c   : > { %1829 = vmatmul.mubr.msk.f32.vlgmr.msra.gmra.mxu0 %vm1083_vm2, %v881_v52  ;;  %1833 = vmatmul.mubr.msk.f32.vlgmr.msra.gmra.mxu1 %vm1083_vm2, %v881_v52 }
 0x10d   : > { %1166 = vmatprep.mubr.f32.mxu0 %v2011_v0  ;;  %1255 = vmatprep.mubr.f32.mxu1 %v2011_v0  ;;  %v1080_v5 = vpop.f32.mrf.mxu1 }
 0x10e   : > { %1837 = vmatprep.subr.msk.mxu0 %vm420_vm0, %v2149_v8  ;;  %1840 = vmatprep.subr.msk.mxu1 %vm420_vm0, %v2153_v9  ;;  %v883_v8 = vld [vmem:[%s2381_s4 + $0x10] sm:$0xff]  ;;  %v971_v9 = vpop.f32.mrf.mxu0 }
 0x10f   : > { %1838 = vmatpush1.msk.msra.mxu0 %vm420_vm0, %v2143_v6  ;;  %1841 = vmatpush1.msk.msra.mxu1 %vm420_vm0, %v2145_v7  ;;  %v884_v6 = vld [vmem:[%s2381_s4 + $0x18] sm:$0xff]  ;;  %v1359_v7 = vld [vmem:[%s2385_s8] sm:$0xff] }
 0x110   : > { %1830 = vmatmul.mubr.msk.f32.gmra.mxu0 %vm1083_vm2, %v882_v53  ;;  %1834 = vmatmul.mubr.msk.f32.gmra.mxu1 %vm1083_vm2, %v882_v53  ;;  %v973_v55 = vpop.f32.mrf.mxu0 }
 0x111   : > { %1172 = vmatprep.mubr.f32.mxu0 %v2011_v0  ;;  %1261 = vmatprep.mubr.f32.mxu1 %v2011_v0 }
 0x112   : > { %v977_v57 = vpop.f32.mrf.mxu0 }
 0x114   : > { %1831 = vmatmul.mubr.msk.f32.gmra.mxu0 %vm1083_vm2, %v883_v8  ;;  %1835 = vmatmul.mubr.msk.f32.gmra.mxu1 %vm1083_vm2, %v883_v8  ;;  %v979_v59 = vpop.f32.mrf.mxu0 }
 0x115   : > { %1178 = vmatprep.mubr.f32.mxu0 %v2011_v0  ;;  %1267 = vmatprep.mubr.f32.mxu1 %v2011_v0 }
 0x116   : > { %v983_v61 = vpop.f32.mrf.mxu0 }
 0x118   : > { %1832 = vmatmul.mubr.msk.f32.gmra.mxu0 %vm1083_vm2, %v884_v6  ;;  %1836 = vmatmul.mubr.msk.f32.gmra.mxu1 %vm1083_vm2, %v884_v6  ;;  %v985_v63 = vpop.f32.mrf.mxu0 }
 0x119   : > { %1428 = vmatprep.mubr.f32.mxu0 %v2011_v0  ;;  %1499 = vmatprep.mubr.f32.mxu1 %v2011_v0 }
 0x11a   : > { %v989_v2 = vpop.f32.mrf.mxu0 }
 0x11c   : > { %1839 = vmatmul.mubr.msk.f32.vlgmr.msra.gmra.mxu0 %vm407_vm1, %v1359_v7  ;;  %1842 = vmatmul.mubr.msk.f32.vlgmr.msra.gmra.mxu1 %vm407_vm1, %v1359_v7  ;;  %v991_v4 = vpop.f32.mrf.mxu0  ;;  %v1277_v7 = vpop.permute.xlu1 %1276 }
 0x11d   : > { %1573 = vmatprep.mubr.f32.mxu0 %v2011_v0  ;;  %1644 = vmatprep.mubr.f32.mxu1 %v2011_v0 }
 0x1cc   : > { %v1162_v10 = vpop.f32.mrf.mxu0  ;;  %v1251_v11 = vpop.f32.mrf.mxu1 }
 0x1cd   : > { %v1163_v48 = vadd.f32 %v1162_v10, %v971_v9  ;;  %v1252_v49 = vadd.f32 %v1251_v11, %v1060_v54 }
 0x1ce   : > { %v1164_v12 = vpop.f32.mrf.mxu0  ;;  %v1253_v0 = vpop.f32.mrf.mxu1 }
 0x1cf   : > { %v1165_v35 = vadd.f32 %v1164_v12, %v973_v55  ;;  %v1254_v33 = vadd.f32 %v1253_v0, %v1062_v56  ;;  %v1296_v9 = vadd.f32 %v1277_v7, %v1252_v49 }
 0x1d0   : > { %v1168_v13 = vpop.f32.mrf.mxu0  ;;  %v1257_v14 = vpop.f32.mrf.mxu1 }
 0x1d1   : > { %v1169_v41 = vadd.f32 %v1168_v13, %v977_v57  ;;  %v1258_v42 = vadd.f32 %v1257_v14, %v1066_v58  ;;  %v1312_v0 = vmax.f32 %v1296_v9, 0.0  ;;  %v1358_v13 = vld [vmem:[%s2384_s7] sm:$0xff] }
 0x1d2   : > { %v1170_v15 = vpop.f32.mrf.mxu0  ;;  %v1259_v16 = vpop.f32.mrf.mxu1 }
 0x1d3   : > { %v1171_v31 = vadd.f32 %v1170_v15, %v979_v59  ;;  %v1260_v32 = vadd.f32 %v1259_v16, %v1068_v60  ;;  %v1298_v55 = vadd.f32 %v1282_v47, %v1169_v41  ;;  %v1300_v56 = vadd.f32 %v1282_v47, %v1258_v42 }
 0x1d4   : > { %v1174_v17 = vpop.f32.mrf.mxu0  ;;  %v1263_v18 = vpop.f32.mrf.mxu1  ;;  %v1295_v59 = vadd.f32 %v1277_v7, %v1165_v35  ;;  %v1297_v60 = vadd.f32 %v1277_v7, %v1254_v33 }
 0x1d5   : > { %v1175_v34 = vadd.f32 %v1174_v17, %v983_v61  ;;  %v1264_v36 = vadd.f32 %v1263_v18, %v1072_v62  ;;  %v1299_v52 = vadd.f32 %v1282_v47, %v1171_v31  ;;  %v1301_v53 = vadd.f32 %v1282_v47, %v1260_v32 }
 0x1d6   : > { %v1176_v19 = vpop.f32.mrf.mxu0  ;;  %v1265_v20 = vpop.f32.mrf.mxu1  ;;  %v1311_v10 = vmax.f32 %v1295_v59, 0.0  ;;  %v1313_v11 = vmax.f32 %v1297_v60, 0.0 }
 0x1d7   : > { %v1177_v25 = vadd.f32 %v1176_v19, %v985_v63  ;;  %v1266_v26 = vadd.f32 %v1265_v20, %v1074_v1  ;;  %v1302_v50 = vadd.f32 %v1287_v24, %v1175_v34  ;;  %v1304_v51 = vadd.f32 %v1287_v24, %v1264_v36  ;;  %v1654_v20 = vpop.permute.xlu0 %1653 }
 0x1d8   : > { %v1180_v22 = vpop.f32.mrf.mxu0  ;;  %v1269_v23 = vpop.f32.mrf.mxu1  ;;  %v1294_v63 = vadd.f32 %v1277_v7, %v1163_v48 }
 0x1d9   : > { %v1181_v29 = vadd.f32 %v1180_v22, %v989_v2  ;;  %v1270_v30 = vadd.f32 %v1269_v23, %v1078_v3  ;;  %v1303_v43 = vadd.f32 %v1287_v24, %v1177_v25  ;;  %v1305_v44 = vadd.f32 %v1287_v24, %v1266_v26 }
 0x1da   : > { %v1182_v37 = vpop.f32.mrf.mxu0  ;;  %v1271_v38 = vpop.f32.mrf.mxu1  ;;  %v1318_v54 = vmax.f32 %v1302_v50, 0.0  ;;  %v1320_v1 = vmax.f32 %v1304_v51, 0.0  ;;  %v1315_v2 = vmax.f32 %v1299_v52, 0.0  ;;  %v1317_v3 = vmax.f32 %v1301_v53, 0.0 }
 0x1db   : > { %v1183_v39 = vadd.f32 %v1182_v37, %v991_v4  ;;  %v1272_v40 = vadd.f32 %v1271_v38, %v1080_v5  ;;  %v1306_v27 = vadd.f32 %v1292_v21, %v1181_v29  ;;  %v1308_v28 = vadd.f32 %v1292_v21, %v1270_v30 }
 0x1dc   : > { %v1319_v61 = vmax.f32 %v1303_v43, 0.0  ;;  %v1321_v62 = vmax.f32 %v1305_v44, 0.0  ;;  %v1314_v4 = vmax.f32 %v1298_v55, 0.0  ;;  %v1316_v5 = vmax.f32 %v1300_v56, 0.0  ;;  %v1430_v14 = vpop.f32.mrf.mxu0  ;;  %v1501_v15 = vpop.f32.mrf.mxu1 }
 0x1dd   : > { %v1307_v45 = vadd.f32 %v1292_v21, %v1183_v39  ;;  %v1309_v46 = vadd.f32 %v1292_v21, %v1272_v40  ;;  %v1322_v57 = vmax.f32 %v1306_v27, 0.0  ;;  %v1324_v58 = vmax.f32 %v1308_v28, 0.0 }
 0x1de   : > { %v1310_v12 = vmax.f32 %v1294_v63, 0.0  ;;  %v1432_v16 = vpop.f32.mrf.mxu0  ;;  %v1503_v17 = vpop.f32.mrf.mxu1 }
 0x1df   : > { %v1323_v8 = vmax.f32 %v1307_v45, 0.0  ;;  %v1325_v6 = vmax.f32 %v1309_v46, 0.0 }
 0x1e1   : > { %1533 = vmatprep.subr.mxu0 %v1323_v8  ;;  %1604 = vmatprep.subr.mxu1 %v1325_v6 }
 0x1e2   : > { %1534 = vmatpush1.msra.mxu0 %v1322_v57  ;;  %1605 = vmatpush1.msra.mxu1 %v1324_v58 }
 0x1e3   : > { %1535 = vmatprep.subr.mxu0 %v1319_v61  ;;  %1606 = vmatprep.subr.mxu1 %v1321_v62 }
 0x1e4   : > { %1536 = vmatpush1.msra.mxu0 %v1318_v54  ;;  %1607 = vmatpush1.msra.mxu1 %v1320_v1 }
 0x1e5   : > { %1537 = vmatprep.subr.mxu0 %v1315_v2  ;;  %1608 = vmatprep.subr.mxu1 %v1317_v3 }
 0x1e6   : > { %1538 = vmatpush1.msra.mxu0 %v1314_v4  ;;  %1609 = vmatpush1.msra.mxu1 %v1316_v5 }
 0x1e7   : > { %1539 = vmatprep.subr.mxu0 %v1311_v10  ;;  %1610 = vmatprep.subr.mxu1 %v1313_v11 }
 0x1e8   : > { %1540 = vmatpush1.msra.mxu0 %v1310_v12  ;;  %1611 = vmatpush1.msra.mxu1 %v1312_v0 }
 0x1e9   : > { %1843 = vmatmul.mubr.msk.f32.vlgmr.msra.gmra.mxu0 %vm1083_vm2, %v1358_v13  ;;  %1844 = vmatmul.mubr.msk.f32.vlgmr.msra.gmra.mxu1 %vm1083_vm2, %v1358_v13 }
 0x2a9   : > { %v1575_v18 = vpop.f32.mrf.mxu0  ;;  %v1646_v19 = vpop.f32.mrf.mxu1 }
 0x2aa   : > { %v1576_v21 = vadd.f32 %v1575_v18, %v1430_v14  ;;  %v1647_v22 = vadd.f32 %v1646_v19, %v1501_v15 }
 0x2ab   : > { %v1577_v23 = vpop.f32.mrf.mxu0  ;;  %v1648_v24 = vpop.f32.mrf.mxu1 }
 0x2ac   : > { %v1656_v25 = vadd.f32 %v1654_v20, %v1576_v21  ;;  %v1658_v26 = vadd.f32 %v1654_v20, %v1647_v22  ;;  %v1578_v29 = vadd.f32 %v1577_v23, %v1432_v16  ;;  %v1649_v30 = vadd.f32 %v1648_v24, %v1503_v17 }
 0x2ae   : > { %v1660_v35 = vmax.f32 %v1656_v25, 0.0  ;;  %v1662_v33 = vmax.f32 %v1658_v26, 0.0  ;;  %v1657_v34 = vadd.f32 %v1654_v20, %v1578_v29  ;;  %v1659_v36 = vadd.f32 %v1654_v20, %v1649_v30 }
 0x2b0   : > { %v1845_v37 = vmul.f32 -1.442695, %v1660_v35  ;;  %v1847_v38 = vmul.f32 -1.442695, %v1662_v33  ;;  %v1661_v31 = vmax.f32 %v1657_v34, 0.0  ;;  %v1663_v32 = vmax.f32 %v1659_v36, 0.0 }
 0x2b2   : > { %1917 = vpow2.f32 %v1845_v37  ;;  %v1846_v39 = vmul.f32 -1.442695, %v1661_v31  ;;  %v1848_v40 = vmul.f32 -1.442695, %v1663_v32 }
 0x2b3   : > { %1919 = vpow2.f32 %v1847_v38 }
 0x2b4   : > { %1921 = vpow2.f32 %v1846_v39 }
 0x2b5   : > { %1923 = vpow2.f32 %v1848_v40 }
 0x2bf   : > { %v1918_v41 = vpop.eup %1917 }
 0x2c0   : > { %v1920_v42 = vpop.eup %1919  ;;  %v1676_v27 = vadd.f32 1.0, %v1918_v41 }
 0x2c1   : > { %v1922_v28 = vpop.eup %1921  ;;  %v1678_v43 = vadd.f32 1.0, %v1920_v42 }
 0x2c2   : > { %v1924_v44 = vpop.eup %1923  ;;  %1925 = vrcp.f32 %v1676_v27  ;;  %v1677_v45 = vadd.f32 1.0, %v1922_v28 }
 0x2c3   : > { %1927 = vrcp.f32 %v1678_v43  ;;  %v1679_v46 = vadd.f32 1.0, %v1924_v44 }
 0x2c4   : > { %1929 = vrcp.f32 %v1677_v45 }
 0x2c5   : > { %1931 = vrcp.f32 %v1679_v46 }
 0x2cf   : > { %v1926_v47 = vpop.eup %1925 }
 0x2d0   : > { %v1928_v48 = vpop.eup %1927  ;;  %1688 = vst [vmem:[%s377_s20] sm:$0xff] %v1926_v47 }
 0x2d1   : > { %v1930_v49 = vpop.eup %1929  ;;  %1690 = vst [vmem:[%s377_s20 + $0x10] sm:$0xff] %v1928_v48 }
 0x2d2   : > { %v1932_v50 = vpop.eup %1931  ;;  %1689 = vst [vmem:[%s377_s20 + $0x8] sm:$0xff] %v1930_v49 }
 0x2d3   : > { %1691 = vst [vmem:[%s377_s20 + $0x18] sm:$0xff] %v1932_v50 }
 0x2d4   : > { %1946 = shalt.err (!%p1943_p5)
}
 0x2d5   : > { %s1947_s30 = scalar_lea.hbm %s2331_s21, 512  ;;  %s1951_s19 = scalar_lea.hbm %s2387_s10, 1024 }
 0x2d6   : > { %p1948_p6 = scmp.ne.s32.totalorder %s2331_s21, %s1947_s30  ;;  %p1952_p10 = scmp.lt.s32.totalorder %s2331_s21, %s2387_s10 }
 0x2d7   : > { %p1953_p11 = scmp.lt.s32.totalorder %s1951_s19, %s1947_s30 }
 0x2d8   : > { %p1949_p7 = pnand %p1948_p6, %p2109_p4 }
 0x2d9   : > { %p1954_p12 = por %p1953_p11, %p1952_p10 }
 0x2da   : > { %p1950_p9 = pneg %p1949_p7 }
 0x2dc   : > { %p1955_p13 = pnand %p1954_p12, %p1950_p9 }
 0x2de   : > { %1958 = shalt.err (!%p1955_p13)
}
 0x2df   : > { %1856 = dma.vmem_to_hbm [thread:$0]  (%p2109_p4), %s2333_s22, 512, %s2331_s21, %s1693_s16  }
 0x2e0 PF: > { %p1862_p0 = scmp.ge.s32.totalorder %s2009_s18, 2  ;;  %s1721_s27 = sand.u32 1, %s1989_s13  }
 0x2e1   : > { %s1722_s17 = scalar_lea.sflag [#allocation5], %s1721_s27 }
 0x2e2   : > { %p1859_p1 = pnand %p1862_p0, %p2116_p8 }
 0x2e4   : > { %p1860_p2 = pneg %p1859_p1 }
 0x2e6   : > { %1984 = dma.done.wait (%p1860_p2), %s1722_s17, 512  }
 0x2e7   : > { %1986 = vsyncadd (%p1860_p2), %s1722_s17, 4294966784  ;;  %s23_s18 = sadd.s32 1, %s2009_s18   ;;  %s2395_s23 = sld [smem:[#allocation9_spill]] }
 0x2e8   : > { %p20_p3 = scmp.ge.s32.totalorder %s23_s18, 4   ;;  %s2396_s16 = sld [smem:[#allocation7_spill]] }
 0x2e9   : > { %s2397_s17 = sld [smem:[#allocation8_spill]]  ;;  %s2398_s13 = smov %s1993_s14 }
 0x2ea   : > { %s2399_s14 = smov %s1997_s15  ;;  %22 = sbr.rel (!%p20_p3) target bundleno = 4 (0x4), region = 95 }
 0x2ed   : > { %s2400_s15 = smov %s2395_s23 }
 0x2ef   :  { %1727 = vsyncpa [#allocation5], 1 }
 0x2f0   :  { %1729 = vsyncpa [#allocation5 + $0x1], 1 }

</bundles_post_ra>
